<compile_context>
chip_gen: v7x
topology: tpu7x:2x2x1
jax: 0.10.0
libtpu: 0.0.40
codegen_flags: <defaults>
</compile_context>

<pallas_src>
import functools

import jax
import jax.numpy as jnp
from jax.experimental import pallas as pl
from jax.experimental.pallas import tpu as pltpu


# ----------------------------- hardware queries ------------------------------

@functools.lru_cache(maxsize=1)
def _device_kind():
    try:
        return jax.devices()[0].device_kind.lower()
    except Exception:
        return ""


@functools.lru_cache(maxsize=1)
def _vmem_capacity_bytes():
    try:
        cap = int(pltpu.get_tpu_info().vmem_capacity_bytes)
        if cap > 0:
            return cap
    except Exception:
        pass
    # Fallback: v7x has 64 MiB per TensorCore, v5e/v6e have 128 MiB.
    return (64 if "v7" in _device_kind() else 128) * 1024 * 1024


@functools.lru_cache(maxsize=1)
def _num_tensorcores():
    kind = _device_kind()
    if any(tag in kind for tag in ("v7", "v4", "v5p", "v5 p")):
        return 2
    return 1


@functools.lru_cache(maxsize=1)
def _has_bf16_vpu():
    # v6e / v7x have bf16 VALU lanes; v5e does not.
    kind = _device_kind()
    return ("v6" in kind) or ("v7" in kind)


def _round_up(v, m):
    return ((v + m - 1) // m) * m


def _sublane(min_itemsize):
    if min_itemsize >= 4:
        return 8
    if min_itemsize == 2:
        return 16
    return 32


# --------------------------------- kernel ------------------------------------

def _make_rff_kernel(epi_dtype):
    """3x [x @ W + b -> ReLU] on one (tm, d) row tile.

    Matmuls run in the weight dtype (bf16 by default) with f32 accumulation
    on the MXU; the bias+ReLU epilogue runs in `epi_dtype` (bf16 on v6e/v7x,
    f32 on v5e).
    """

    def kernel(x_ref, w1_ref, b1_ref, w2_ref, b2_ref, w3_ref, b3_ref, o_ref):
        cdt = w1_ref.dtype  # MXU compute dtype

        def layer(h, w_ref, b_ref):
            acc = jnp.dot(h.astype(cdt), w_ref[...],
                          preferred_element_type=jnp.float32)
            acc = acc.astype(epi_dtype) + b_ref[...].astype(epi_dtype)
            return jnp.maximum(acc, 0)

        h = layer(x_ref[...], w1_ref, b1_ref)
        h = layer(h, w2_ref, b2_ref)
        h = layer(h, w3_ref, b3_ref)
        o_ref[...] = h.astype(o_ref.dtype)

    return kernel


# ----------------------------- tiling decisions -------------------------------

def _choose_row_tile(M, d, x_bytes, out_bytes, w_bytes, budget, num_cores):
    """Pick the row tile: as large as VMEM allows (amortizes grid-step
    overhead and the VPU epilogue); only force >=2 grid steps on
    multi-TensorCore parts."""
    sub = _sublane(min(x_bytes, out_bytes))

    # Weights/biases are grid-resident (constant index_map) but still
    # double-buffered by the default pipeline -> count 2x.
    weight_bytes = 2 * (3 * d * d * w_bytes + 3 * d * 4)
    # TODO(synk): when 3*d*d*w_bytes exceeds ~60% of VMEM (d >= ~3072 on
    # v7x), stream (d, dn) output panels of each weight with
    # pltpu.emit_pipeline, keeping the (tm, d) activation in VMEM scratch
    # between layers, instead of holding full (d, d) blocks resident.
    tile_budget = max(budget - weight_bytes, 2 * 1024 * 1024)

    def fits(tm):
        # 2x-buffered x tile + 2x-buffered out tile + f32 intermediates.
        return tm * d * (2 * x_bytes + 2 * out_bytes + 16) <= tile_budget

    # Whole problem in one block (block == full dim, always layout-legal)
    # whenever a second TensorCore would not help.
    if fits(M) and (num_cores == 1 or M < 256):
        return M

    cap = min(1024, max(sub, _round_up(M, sub)))
    if num_cores > 1:
        cap = min(cap, max(sub, _round_up(pl.cdiv(M, num_cores), sub)))

    tm = sub
    while 2 * tm <= cap and fits(2 * tm):
        tm *= 2
    return tm


def _vmem_limit_bytes(tm, d, x_bytes, out_bytes, w_bytes):
    cap = _vmem_capacity_bytes()
    est = (2 * (3 * d * d * w_bytes + 3 * d * 4)
           + tm * d * (2 * x_bytes + 2 * out_bytes + 16))
    hi = int(cap * 0.8)  # ~102 MiB on 128 MiB parts, ~51 MiB on v7x (headroom)
    return int(min(max(int(est * 1.5), 32 * 1024 * 1024), hi))


# ------------------------------ pallas builder --------------------------------

@functools.lru_cache(maxsize=None)
def _build_rff_fn(M, d, tm, x_dtype_name, w_dtype_name, out_dtype_name,
                  epi_dtype_name, vmem_limit):
    x_dtype = jnp.dtype(x_dtype_name)
    w_dtype = jnp.dtype(w_dtype_name)
    out_dtype = jnp.dtype(out_dtype_name)
    epi_dtype = jnp.dtype(epi_dtype_name)
    grid = (pl.cdiv(M, tm),)

    cost = pl.CostEstimate(
        flops=6 * M * d * d,  # 3 matmuls, 2 flops per MAC
        transcendentals=0,
        bytes_accessed=(M * d * (x_dtype.itemsize + out_dtype.itemsize)
                        + 3 * d * d * w_dtype.itemsize + 3 * d * 4),
    )

    call = pl.pallas_call(
        _make_rff_kernel(epi_dtype),
        out_shape=jax.ShapeDtypeStruct((M, d), out_dtype),
        grid_spec=pltpu.PrefetchScalarGridSpec(
            num_scalar_prefetch=0,
            grid=grid,
            in_specs=[
                pl.BlockSpec((tm, d), lambda i: (i, 0)),   # x rows
                pl.BlockSpec((d, d), lambda i: (0, 0)),    # w1 (resident)
                pl.BlockSpec((1, d), lambda i: (0, 0)),    # b1
                pl.BlockSpec((d, d), lambda i: (0, 0)),    # w2
                pl.BlockSpec((1, d), lambda i: (0, 0)),    # b2
                pl.BlockSpec((d, d), lambda i: (0, 0)),    # w3
                pl.BlockSpec((1, d), lambda i: (0, 0)),    # b3
            ],
            out_specs=pl.BlockSpec((tm, d), lambda i: (i, 0)),
        ),
        compiler_params=pltpu.CompilerParams(
            dimension_semantics=("parallel",),
            vmem_limit_bytes=vmem_limit,
        ),
        cost_estimate=cost,
    )

    @jax.jit
    def fn(x, w1, b1, w2, b2, w3, b3):
        out = call(x.reshape(M, d), w1, b1, w2, b2, w3, b3)
        return out.reshape(x.shape)

    return fn


# --------------------------------- public API ---------------------------------

def prepare_rff_params(params, compute_dtype=jnp.bfloat16):
    """Cast the weights ONCE to the MXU compute dtype (bf16 by default) and
    biases to f32 (1, d). Do this at init time so the kernel reads bf16
    weights directly from HBM on every forward call.
    Note: compute_dtype=None keeps full f32 weights/matmuls (matches PyTorch
    f32 numerics exactly, at ~2x the weight HBM/VMEM footprint)."""
    w_dtype = (jnp.dtype(compute_dtype) if compute_dtype is not None
               else jnp.dtype(params["w1"].dtype))
    prep = {}
    for i in (1, 2, 3):
        prep[f"w{i}"] = jnp.asarray(params[f"w{i}"], w_dtype)
        prep[f"b{i}"] = jnp.asarray(params[f"b{i}"], jnp.float32).reshape(1, -1)
    return prep


def rff_forward(x, params, *, row_tile=None):
    """x: [b, n, d]. params: output of prepare_rff_params (w stored [d_in, d_out])."""
    b, n, d = x.shape
    M = b * n
    x_dtype = jnp.dtype(x.dtype)
    w_dtype = jnp.dtype(params["w1"].dtype)
    out_dtype = x_dtype
    # bf16 epilogue only where the VPU has bf16 lanes and matmuls are bf16.
    epi_dtype = (jnp.bfloat16 if (_has_bf16_vpu() and w_dtype == jnp.bfloat16)
                 else jnp.float32)

    cap = _vmem_capacity_bytes()
    if row_tile is None:
        tm = _choose_row_tile(M, d, x_dtype.itemsize, out_dtype.itemsize,
                              w_dtype.itemsize, int(cap * 0.7),
                              _num_tensorcores())
    else:
        tm = min(M, max(_sublane(min(x_dtype.itemsize, out_dtype.itemsize)),
                        int(row_tile)))

    vmem_limit = _vmem_limit_bytes(tm, d, x_dtype.itemsize, out_dtype.itemsize,
                                   w_dtype.itemsize)
    fn = _build_rff_fn(M, d, tm, x_dtype.name, w_dtype.name, out_dtype.name,
                       jnp.dtype(epi_dtype).name, vmem_limit)
    return fn(x, params["w1"], params["b1"], params["w2"], params["b2"],
              params["w3"], params["b3"])


# ------------------------------ init & references -----------------------------

def init_rff_params(key, d, dtype=jnp.float32):
    """Deterministic synthetic init mirroring nn.Linear(d, d) param shapes."""
    keys = jax.random.split(key, 6)
    bound = 1.0 / jnp.sqrt(d)

    def lin(kw, kb):
        # PyTorch Linear weight is [out, in]; we store transposed [in, out].
        w = jax.random.uniform(kw, (d, d), dtype, -bound, bound)
        bb = jax.random.uniform(kb, (1, d), dtype, -bound, bound)
        return w, bb

    w1, b1 = lin(keys[0], keys[1])
    w2, b2 = lin(keys[2], keys[3])
    w3, b3 = lin(keys[4], keys[5])
    return {"w1": w1, "b1": b1, "w2": w2, "b2": b2, "w3": w3, "b3": b3}


def rff_reference(x, prepared_params, epi_dtype=None):
    """Pure-JAX reference mirroring the kernel's dtype handling exactly."""
    cdt = prepared_params["w1"].dtype
    if epi_dtype is None:
        epi_dtype = (jnp.bfloat16 if (_has_bf16_vpu() and cdt == jnp.bfloat16)
                     else jnp.float32)

    def layer(h, w, bias):
        acc = jnp.dot(h.astype(cdt), w, preferred_element_type=jnp.float32)
        acc = acc.astype(epi_dtype) + bias.astype(epi_dtype)
        return jnp.maximum(acc, 0)

    b, n, d = x.shape
    h = x.reshape(b * n, d)
    h = layer(h, prepared_params["w1"], prepared_params["b1"])
    h = layer(h, prepared_params["w2"], prepared_params["b2"])
    h = layer(h, prepared_params["w3"], prepared_params["b3"])
    return h.astype(x.dtype).reshape(b, n, d)


def rff_reference_f32(x, raw_params):
    """Full-f32 reference matching the PyTorch module's numerics."""
    def layer(h, w, bias):
        return jnp.maximum(jnp.dot(h, w) + bias[0], 0.0)

    h = layer(x, raw_params["w1"], raw_params["b1"])
    h = layer(h, raw_params["w2"], raw_params["b2"])
    h = layer(h, raw_params["w3"], raw_params["b3"])
    return h.astype(x.dtype)


# ----------------------------------- test -------------------------------------

if __name__ == "__main__":
    b, n, d = 2, 8, 32
    key = jax.random.PRNGKey(0)
    kx, kp = jax.random.split(key)
    x = jax.random.normal(kx, (b, n, d), jnp.float32)

    raw_params = init_rff_params(kp, d)
    params = prepare_rff_params(raw_params, compute_dtype=jnp.bfloat16)

    out = jax.block_until_ready(rff_forward(x, params))
    assert out.shape == (b, n, d)

    # Tight check vs. a reference that mirrors the kernel's dtype handling,
    # plus a loose check vs. the pure-f32 (PyTorch-numerics) reference.
    ref_mirror = rff_reference(x, params)
    ref_f32 = rff_reference_f32(x, raw_params)
    assert jnp.allclose(out, ref_mirror, atol=2e-3, rtol=2e-3), \
        "mismatch vs dtype-mirrored reference"
    assert jnp.allclose(out, ref_f32, atol=5e-2, rtol=5e-2), \
        "mismatch vs f32 reference"

    print("KERNEL_OK")
</pallas_src>

<mosaic_0001>
module attributes {stable_mosaic.version = 11 : i64} {
  func.func @kernel(%arg0: i32, %arg1: memref<16x32xf32, #tpu.memory_space<vmem>>, %arg2: memref<32x32xbf16, #tpu.memory_space<vmem>>, %arg3: memref<1x32xf32, #tpu.memory_space<vmem>>, %arg4: memref<32x32xbf16, #tpu.memory_space<vmem>>, %arg5: memref<1x32xf32, #tpu.memory_space<vmem>>, %arg6: memref<32x32xbf16, #tpu.memory_space<vmem>>, %arg7: memref<1x32xf32, #tpu.memory_space<vmem>>, %arg8: memref<16x32xf32, #tpu.memory_space<vmem>>) attributes {dimension_semantics = [#tpu.dimension_semantics<parallel>], iteration_bounds = array<i64: 1>, scalar_prefetch = 0 : i64, scratch_operands = 0 : i64, tpu.core_type = #tpu.core_type<tc>, window_params = [{transform_indices = @transform_0, window_bounds = array<i64: 16, 32>}, {pipeline_mode = #tpu.pipeline_mode<synchronous>, transform_indices = @transform_1, window_bounds = array<i64: 32, 32>}, {pipeline_mode = #tpu.pipeline_mode<synchronous>, transform_indices = @transform_2, window_bounds = array<i64: 1, 32>}, {pipeline_mode = #tpu.pipeline_mode<synchronous>, transform_indices = @transform_3, window_bounds = array<i64: 32, 32>}, {pipeline_mode = #tpu.pipeline_mode<synchronous>, transform_indices = @transform_4, window_bounds = array<i64: 1, 32>}, {pipeline_mode = #tpu.pipeline_mode<synchronous>, transform_indices = @transform_5, window_bounds = array<i64: 32, 32>}, {pipeline_mode = #tpu.pipeline_mode<synchronous>, transform_indices = @transform_6, window_bounds = array<i64: 1, 32>}, {transform_indices = @transform_7, window_bounds = array<i64: 16, 32>}]} {
    %c0 = arith.constant 0 : index
    %c0_0 = arith.constant 0 : index
    %0 = vector.load %arg1[%c0, %c0_0] : memref<16x32xf32, #tpu.memory_space<vmem>>, vector<16x32xf32>
    %1 = arith.truncf %0 : vector<16x32xf32> to vector<16x32xbf16>
    %c0_1 = arith.constant 0 : index
    %c0_2 = arith.constant 0 : index
    %2 = vector.load %arg2[%c0_1, %c0_2] : memref<32x32xbf16, #tpu.memory_space<vmem>>, vector<32x32xbf16>
    %cst = arith.constant dense<0.000000e+00> : vector<16x32xf32>
    %3 = tpu.matmul %1, %2, %cst {dimension_numbers = #tpu.dot_dimension_numbers<[1], [0], [0], [1], [0, 0, 1, 1], [], []>} : vector<16x32xbf16>, vector<32x32xbf16>, vector<16x32xf32> -> vector<16x32xf32>
    %c0_3 = arith.constant 0 : index
    %c0_4 = arith.constant 0 : index
    %4 = vector.load %arg3[%c0_3, %c0_4] : memref<1x32xf32, #tpu.memory_space<vmem>>, vector<1x32xf32>
    %5 = vector.broadcast %4 : vector<1x32xf32> to vector<16x32xf32>
    %6 = arith.addf %3, %5 : vector<16x32xf32>
    %cst_5 = arith.constant 0.000000e+00 : f32
    %7 = vector.broadcast %cst_5 : f32 to vector<16x32xf32>
    %8 = arith.maximumf %6, %7 : vector<16x32xf32>
    %9 = arith.truncf %8 : vector<16x32xf32> to vector<16x32xbf16>
    %c0_6 = arith.constant 0 : index
    %c0_7 = arith.constant 0 : index
    %10 = vector.load %arg4[%c0_6, %c0_7] : memref<32x32xbf16, #tpu.memory_space<vmem>>, vector<32x32xbf16>
    %cst_8 = arith.constant dense<0.000000e+00> : vector<16x32xf32>
    %11 = tpu.matmul %9, %10, %cst_8 {dimension_numbers = #tpu.dot_dimension_numbers<[1], [0], [0], [1], [0, 0, 1, 1], [], []>} : vector<16x32xbf16>, vector<32x32xbf16>, vector<16x32xf32> -> vector<16x32xf32>
    %c0_9 = arith.constant 0 : index
    %c0_10 = arith.constant 0 : index
    %12 = vector.load %arg5[%c0_9, %c0_10] : memref<1x32xf32, #tpu.memory_space<vmem>>, vector<1x32xf32>
    %13 = vector.broadcast %12 : vector<1x32xf32> to vector<16x32xf32>
    %14 = arith.addf %11, %13 : vector<16x32xf32>
    %cst_11 = arith.constant 0.000000e+00 : f32
    %15 = vector.broadcast %cst_11 : f32 to vector<16x32xf32>
    %16 = arith.maximumf %14, %15 : vector<16x32xf32>
    %17 = arith.truncf %16 : vector<16x32xf32> to vector<16x32xbf16>
    %c0_12 = arith.constant 0 : index
    %c0_13 = arith.constant 0 : index
    %18 = vector.load %arg6[%c0_12, %c0_13] : memref<32x32xbf16, #tpu.memory_space<vmem>>, vector<32x32xbf16>
    %cst_14 = arith.constant dense<0.000000e+00> : vector<16x32xf32>
    %19 = tpu.matmul %17, %18, %cst_14 {dimension_numbers = #tpu.dot_dimension_numbers<[1], [0], [0], [1], [0, 0, 1, 1], [], []>} : vector<16x32xbf16>, vector<32x32xbf16>, vector<16x32xf32> -> vector<16x32xf32>
    %c0_15 = arith.constant 0 : index
    %c0_16 = arith.constant 0 : index
    %20 = vector.load %arg7[%c0_15, %c0_16] : memref<1x32xf32, #tpu.memory_space<vmem>>, vector<1x32xf32>
    %21 = vector.broadcast %20 : vector<1x32xf32> to vector<16x32xf32>
    %22 = arith.addf %19, %21 : vector<16x32xf32>
    %cst_17 = arith.constant 0.000000e+00 : f32
    %23 = vector.broadcast %cst_17 : f32 to vector<16x32xf32>
    %24 = arith.maximumf %22, %23 : vector<16x32xf32>
    %c0_18 = arith.constant 0 : index
    %c0_19 = arith.constant 0 : index
    %25 = vector.load %arg8[%c0_18, %c0_19] : memref<16x32xf32, #tpu.memory_space<vmem>>, vector<16x32xf32>
    tpu.vector_store %arg8[%c0_18, %c0_19], %24 {strides = array<i32>} : memref<16x32xf32, #tpu.memory_space<vmem>>, vector<16x32xf32>,
    return
  }
  func.func @transform_0(%arg0: i32) -> (i32, i32) {
    %c0_i32 = arith.constant 0 : i32
    %c0_i32_0 = arith.constant 0 : i32
    return %arg0, %c0_i32 : i32, i32
  }
  func.func @transform_1(%arg0: i32) -> (i32, i32) {
    %c0_i32 = arith.constant 0 : i32
    %c0_i32_0 = arith.constant 0 : i32
    %c0_i32_1 = arith.constant 0 : i32
    return %c0_i32, %c0_i32_0 : i32, i32
  }
  func.func @transform_2(%arg0: i32) -> (i32, i32) {
    %c0_i32 = arith.constant 0 : i32
    %c0_i32_0 = arith.constant 0 : i32
    %c0_i32_1 = arith.constant 0 : i32
    return %c0_i32, %c0_i32_0 : i32, i32
  }
  func.func @transform_3(%arg0: i32) -> (i32, i32) {
    %c0_i32 = arith.constant 0 : i32
    %c0_i32_0 = arith.constant 0 : i32
    %c0_i32_1 = arith.constant 0 : i32
    return %c0_i32, %c0_i32_0 : i32, i32
  }
  func.func @transform_4(%arg0: i32) -> (i32, i32) {
    %c0_i32 = arith.constant 0 : i32
    %c0_i32_0 = arith.constant 0 : i32
    %c0_i32_1 = arith.constant 0 : i32
    return %c0_i32, %c0_i32_0 : i32, i32
  }
  func.func @transform_5(%arg0: i32) -> (i32, i32) {
    %c0_i32 = arith.constant 0 : i32
    %c0_i32_0 = arith.constant 0 : i32
    %c0_i32_1 = arith.constant 0 : i32
    return %c0_i32, %c0_i32_0 : i32, i32
  }
  func.func @transform_6(%arg0: i32) -> (i32, i32) {
    %c0_i32 = arith.constant 0 : i32
    %c0_i32_0 = arith.constant 0 : i32
    %c0_i32_1 = arith.constant 0 : i32
    return %c0_i32, %c0_i32_0 : i32, i32
  }
  func.func @transform_7(%arg0: i32) -> (i32, i32) {
    %c0_i32 = arith.constant 0 : i32
    %c0_i32_0 = arith.constant 0 : i32
    return %arg0, %c0_i32 : i32, i32
  }
}

</mosaic_0001>

<bundles_post_ra>
// kernel: fn.1
= control target key start
LH: loop header
LB: loop body
LE: loop exit
PB: predicated region body
PF: predicated region fallthrough
CT: control target
= control target key end

     0   :  { %12 = vsyncpa [#allocation3], 0  ;;  %s587_s0 = inlined_call_operand.hbm [shape: f32[16,32], index: 0, kind: input, shape index: {}]   ;;  %s588_s1 = inlined_call_operand.hbm [shape: bf16[32,32], index: 1, kind: input, shape index: {}]   ;;  %s589_s2 = inlined_call_operand.vmem [shape: f32[1,32], index: 2, kind: input, shape index: {}]   ;;  %s590_s3 = inlined_call_operand.hbm [shape: bf16[32,32], index: 3, kind: input, shape index: {}]   ;;  %s591_s4 = inlined_call_operand.vmem [shape: f32[1,32], index: 4, kind: input, shape index: {}]   ;;  %s592_s5 = inlined_call_operand.vmem [shape: bf16[32,32], index: 5, kind: input, shape index: {}]   ;;  %s593_s6 = inlined_call_operand.vmem [shape: f32[1,32], index: 6, kind: input, shape index: {}]   ;;  %s594_s7 = inlined_call_operand.hbm [shape: f32[16,32], index: 7, kind: output, shape index: {}]  }
   0x1   :  { %13 = vsyncpa [#allocation6], 0 }
   0x2   :  { %14 = vsyncpa [#allocation4], 0  ;;  %s457_s24 = smov [#allocation5]   ;;  %s363_s28 = scalar_lea.hbm %s588_s1, 256 }
   0x3   :  { %s32_s25 = sshll.u32 %s457_s24, 4  ;;  %p364_p0 = scmp.ne.s32.totalorder %s588_s1, %s363_s28  ;;  %s33_s25 = int_to_ptr.vmem [resolvable:$true] %s32_s25 }
   0x4   :  { %p367_p1 = scmp.lt.u32.totalorder %s363_s28, %s588_s1 }
   0x6   :  { %p369_p2 = pnand %p367_p1, %p364_p0 }
   0x8   :  { %372 = shalt.err (!%p369_p2)
}
   0x9   :  { %s373_s10 = scalar_lea.vmem %s33_s25, 256  ;;  %p378_p4 = scmp.lt.s32.totalorder %s33_s25, %s33_s25 }
   0xa   :  { %p374_p3 = scmp.ne.s32.totalorder %s33_s25, %s373_s10  ;;  %p379_p5 = scmp.lt.s32.totalorder %s373_s10, %s373_s10 }
   0xc   :  { %p380_p6 = por %p379_p5, %p378_p4 }
   0xe   :  { %p381_p7 = pnand %p380_p6, %p374_p3 }
  0x10   :  { %384 = shalt.err (!%p381_p7)
}
  0x11   :  { %s458_s11 = smov 64   ;;  %s459_s12 = smov 4  }
  0x12   :  { %38 = dma.hbm_to_vmem [thread:$0]  %s588_s1, 256, %s33_s25, [#allocation6], %s458_s11, %s458_s11, %s459_s12  }
  0x13   :  { %s460_s15 = smov [#allocation2]   ;;  %s385_s19 = scalar_lea.hbm %s587_s0, 256 }
  0x14   :  { %s20_s16 = sshll.u32 %s460_s15, 4  ;;  %p386_p8 = scmp.ne.s32.totalorder %s587_s0, %s385_s19  ;;  %s21_s16 = int_to_ptr.vmem [resolvable:$true] %s20_s16 }
  0x15   :  { %p389_p9 = scmp.lt.u32.totalorder %s385_s19, %s587_s0 }
  0x17   :  { %p391_p10 = pnand %p389_p9, %p386_p8 }
  0x19   :  { %394 = shalt.err (!%p391_p10)
}
  0x1a   :  { %s395_s24 = scalar_lea.vmem %s21_s16, 256  ;;  %p400_p12 = scmp.lt.s32.totalorder %s21_s16, %s21_s16 }
  0x1b   :  { %p396_p11 = scmp.ne.s32.totalorder %s21_s16, %s395_s24  ;;  %p401_p13 = scmp.lt.s32.totalorder %s395_s24, %s395_s24 }
  0x1d   :  { %p402_p0 = por %p401_p13, %p400_p12 }
  0x1f   :  { %p403_p1 = pnand %p402_p0, %p396_p11 }
  0x21   :  { %406 = shalt.err (!%p403_p1)
}
  0x22   :  { %s461_s1 = smov 128   ;;  %s462_s25 = smov 8  }
  0x23   :  { %26 = dma.hbm_to_vmem [thread:$0]  %s587_s0, 256, %s21_s16, [#allocation3], %s461_s1, %s461_s1, %s462_s25  }
  0x24   :  { %s463_s28 = smov [#allocation7]   ;;  %s407_s9 = scalar_lea.hbm %s590_s3, 256 }
  0x25   :  { %s46_s29 = sshll.u32 %s463_s28, 4  ;;  %p408_p2 = scmp.ne.s32.totalorder %s590_s3, %s407_s9  ;;  %s47_s29 = int_to_ptr.vmem [resolvable:$true] %s46_s29 }
  0x26   :  { %p411_p3 = scmp.lt.u32.totalorder %s407_s9, %s590_s3 }
  0x28   :  { %p413_p4 = pnand %p411_p3, %p408_p2 }
  0x2a   :  { %416 = shalt.err (!%p413_p4)
}
  0x2b   :  { %s417_s17 = scalar_lea.vmem %s47_s29, 256  ;;  %p422_p6 = scmp.lt.s32.totalorder %s47_s29, %s47_s29 }
  0x2c   :  { %p418_p5 = scmp.ne.s32.totalorder %s47_s29, %s417_s17  ;;  %p423_p7 = scmp.lt.s32.totalorder %s417_s17, %s417_s17 }
  0x2e   :  { %p424_p8 = por %p423_p7, %p422_p6 }
  0x30   :  { %p425_p9 = pnand %p424_p8, %p418_p5 }
  0x32   :  { %428 = shalt.err (!%p425_p9)
}
  0x33   :  { %52 = dma.hbm_to_vmem [thread:$0]  %s590_s3, 256, %s47_s29, [#allocation6], %s458_s11, %s458_s11, %s459_s12  }
  0x34   :  { %451 = dma.done.wait [#allocation3], 256  }
  0x35   :  { %452 = vsyncadd [#allocation3], 4294967040 }
  0x36   :  { %453 = dma.done.wait [#allocation6], 512  }
  0x37   :  { %454 = vsyncadd [#allocation6], 4294966784  ;;  %v464_v0 = vmov 0.0   ;;  %vm465_vm0 = vmmov 0   ;;  %v357_v1 = vld [vmem:[#allocation5] sm:$0xff]   ;;  %v358_v2 = vld [vmem:[#allocation5 + $0x8] sm:$0xff]  }
  0x38   :  { %323 = vmatprep.subr.bf16.mxu0 %v464_v0  ;;  %327 = vmatprep.mubr.msk.bf16.mxu0 %vm465_vm0, %v464_v0  ;;  %v69_v3 = vld [vmem:[#allocation2] sm:$0xff]  ;;  %v70_v4 = vld [vmem:[#allocation2 + $0x8] sm:$0xff]  ;;  %vm95_vm1 = vcmask 261120  }
  0x39   :  { %331 = vmatprep.subr.bf16.mxu1 %v464_v0  ;;  %335 = vmatprep.mubr.msk.bf16.mxu1 %vm465_vm0, %v464_v0  ;;  %v71_v5 = vpack.c.bf16 %v70_v4, %v69_v3  ;;  %v359_v6 = vld [vmem:[#allocation7] sm:$0xff]   ;;  %v360_v7 = vld [vmem:[#allocation7 + $0x8] sm:$0xff]  }
  0x3a   :  { %324 = vmatpush3.bf16.msra.mxu0 %v357_v1  ;;  %332 = vmatpush3.bf16.msra.mxu1 %v359_v6  ;;  %v302_v8 = vld [vmem:[%s589_s2] ss:$0 sm:$0xff]  ;;  %v362_v19 = vld [vmem:[%s592_s5 + $0x8] sm:$0xff]  }
  0x3b   :  { %325 = vmatprep.subr.bf16.mxu0 %v464_v0  ;;  %333 = vmatprep.subr.bf16.mxu1 %v464_v0  ;;  %v361_v18 = vld [vmem:[%s592_s5] sm:$0xff]  }
  0x3c   :  { %v306_v20 = vld [vmem:[%s591_s4] ss:$0 sm:$0xff]  ;;  %s466_s4 = smov [#allocation8]  }
  0x3d   :  { %v310_v30 = vld [vmem:[%s593_s6] ss:$0 sm:$0xff]  ;;  %s289_s5 = sshll.u32 %s466_s4, 4  ;;  %s290_s5 = int_to_ptr.vmem [resolvable:$true] %s289_s5 }
  0x3e   :  { %326 = vmatpush3.bf16.msra.mxu0 %v358_v2  ;;  %334 = vmatpush3.bf16.msra.mxu1 %v360_v7  ;;  %s429_s24 = scalar_lea.vmem %s290_s5, 256  ;;  %p434_p11 = scmp.lt.s32.totalorder %s290_s5, %s290_s5 }
  0x3f   :  { %339 = vmatprep.subr.bf16.mxu0 %v464_v0  ;;  %p430_p10 = scmp.ne.s32.totalorder %s290_s5, %s429_s24  ;;  %p435_p12 = scmp.lt.s32.totalorder %s429_s24, %s429_s24 }
  0x41   :  { %328 = vmatmul.mubr.msk.bf16.vlgmr.msra.gmra.mrb[0].mxu0 %vm95_vm1, %v71_v5  ;;  %p436_p13 = por %p435_p12, %p434_p11 }
  0x42   :  { %343 = vmatprep.mubr.msk.bf16.mxu0 %vm465_vm0, %v464_v0  ;;  %340 = vmatpush3.bf16.msra.mxu0 %v361_v18 }
  0x43   :  { %341 = vmatprep.subr.bf16.mxu0 %v464_v0  ;;  %p437_p0 = pnand %p436_p13, %p430_p10 }
  0x46   :  { %342 = vmatpush3.bf16.msra.mxu0 %v362_v19 }
 0x114   :  { %v133_v9 = vpop.f32.mrb[0].mxu0 }
 0x115   :  { %v134_v10 = vadd.f32 %v302_v8, %v133_v9  ;;  %v329_v11 = vpop.f32.mrb[1].mxu0 }
 0x116   :  { %v136_v12 = vpop.f32.mrb[2].mxu0 }
 0x117   :  { %v137_v13 = vadd.f32 %v302_v8, %v136_v12  ;;  %v330_v14 = vpop.f32.mrb[3].mxu0  ;;  %v140_v15 = vmax.f32 %v134_v10, 0.0 }
 0x119   :  { %v141_v16 = vmax.f32 %v137_v13, 0.0 }
 0x11b   :  { %v142_v17 = vpack.c.bf16 %v141_v16, %v140_v15 }
 0x11d   :  { %336 = vmatmul.mubr.msk.bf16.vlgmr.msra.gmra.mrb[0].mxu1 %vm95_vm1, %v142_v17 }
 0x1f0   :  { %v203_v21 = vpop.f32.mrb[0].mxu1 }
 0x1f1   :  { %v204_v22 = vadd.f32 %v306_v20, %v203_v21  ;;  %v337_v23 = vpop.f32.mrb[1].mxu1 }
 0x1f2   :  { %v206_v24 = vpop.f32.mrb[2].mxu1 }
 0x1f3   :  { %v207_v25 = vadd.f32 %v306_v20, %v206_v24  ;;  %v338_v26 = vpop.f32.mrb[3].mxu1  ;;  %v210_v27 = vmax.f32 %v204_v22, 0.0 }
 0x1f5   :  { %v211_v28 = vmax.f32 %v207_v25, 0.0 }
 0x1f7   :  { %v212_v29 = vpack.c.bf16 %v211_v28, %v210_v27 }
 0x1f9   :  { %344 = vmatmul.mubr.msk.bf16.vlgmr.msra.gmra.mrb[4].mxu0 %vm95_vm1, %v212_v29 }
 0x2cc   :  { %v273_v31 = vpop.f32.mrb[4].mxu0 }
 0x2cd   :  { %v274_v32 = vadd.f32 %v310_v30, %v273_v31  ;;  %v345_v33 = vpop.f32.mrb[5].mxu0 }
 0x2ce   :  { %v276_v34 = vpop.f32.mrb[6].mxu0 }
 0x2cf   :  { %v280_v35 = vmax.f32 %v274_v32, 0.0  ;;  %v277_v36 = vadd.f32 %v310_v30, %v276_v34  ;;  %v346_v37 = vpop.f32.mrb[7].mxu0 }
 0x2d1   :  { %282 = vst.msk [vmem:[#allocation8] sm:$0xff] %vm95_vm1, %v280_v35  ;;  %v281_v38 = vmax.f32 %v277_v36, 0.0 }
 0x2d3   :  { %283 = vst.msk [vmem:[#allocation8 + $0x8] sm:$0xff] %vm95_vm1, %v281_v38 }
 0x2d4   :  { %440 = shalt.err (!%p437_p0)
}
 0x2d5   :  { %s441_s27 = scalar_lea.hbm %s594_s7, 256 }
 0x2d6   :  { %p442_p1 = scmp.ne.s32.totalorder %s594_s7, %s441_s27  ;;  %p445_p2 = scmp.lt.u32.totalorder %s441_s27, %s594_s7 }
 0x2d8   :  { %p447_p3 = pnand %p445_p2, %p442_p1 }
 0x2da   :  { %450 = shalt.err (!%p447_p3)
}
 0x2db   :  { %295 = dma.vmem_to_hbm [thread:$0]  %s290_s5, 256, %s594_s7, [#allocation4], %s461_s1, %s461_s1, %s462_s25  }
 0x2dc   :  { %455 = dma.done.wait [#allocation4], 256  }
 0x2dd   :  { %456 = vsyncadd [#allocation4], 4294967040 }
 0x2de   :  { %299 = vsyncpa [#allocation3], 1 }
 0x2df   :  { %300 = vsyncpa [#allocation6], 1 }
 0x2e0   :  { %301 = vsyncpa [#allocation4], 1 }

</bundles_post_ra>
